<compile_context>
chip_gen: v5e
topology: v5e:2x2
jax: 0.10.0
libtpu: 0.0.40
codegen_flags: <defaults>
</compile_context>

<pallas_src>
import jax
import jax.numpy as jnp
from jax.experimental import pallas as pl
from jax.experimental.pallas import tpu as pltpu


def _wn_conv1x1_kernel(w_ref, b_ref, x_ref, o_ref):
    """One lane-dense time tile of y = W @ x + b.

    w_ref: (C, C)   precomputed weight-normed weight (compute dtype)
    b_ref: (C, 1)   bias (f32)
    x_ref: (C, tT)  input tile (batch dim squeezed away by BlockSpec)
    o_ref: (C, tT)  output tile
    """
    # Cast the MXU operand in-vreg only when the compute dtype differs from the
    # input dtype (no-op for the f32 path); HBM DMA stays at the caller's width.
    x = x_ref[...].astype(w_ref.dtype)
    y = jnp.dot(w_ref[...], x, preferred_element_type=jnp.float32)   # MXU, f32 accum
    o_ref[...] = (y + b_ref[...]).astype(o_ref.dtype)                # bias bcast over lanes


def subject_block_task(x, weight_v, weight_g, bias, *,
                       target_tile_bytes=2 << 20, compute_dtype=None):
    """Pallas equivalent of SubjectBlock.forward(..., stage='task').

    Args:
      x:        (B, C, T) input (NCT layout, as PyTorch Conv1d).
      weight_v: (C, C, 1)  weight_norm's weight_v (kernel_size=1).
      weight_g: (C, 1, 1)  weight_norm's weight_g.
      bias:     (C,)       conv bias.
      target_tile_bytes: target HBM input bytes per grid step (tile size is adaptive).
      compute_dtype: MXU operand dtype. None = auto (f32 for small C / f32 inputs,
                     bf16 for large C or bf16 inputs).
    Returns:
      (B, C, T) array with x.dtype.
    """
    B, C, T = x.shape
    out_dtype = x.dtype

    if compute_dtype is None:
        # HBM-bound op: keep exact f32 unless C is large enough for MXU time to matter
        # or the input is already bf16.
        compute_dtype = jnp.bfloat16 if (C > 128 or x.dtype == jnp.bfloat16) else jnp.float32

    # ---- Hoisted weight-norm reparameterization (batch/time invariant) ----------
    wv = weight_v.reshape(C, C).astype(jnp.float32)
    scale = weight_g.reshape(C, 1).astype(jnp.float32) * jax.lax.rsqrt(
        jnp.sum(wv * wv, axis=1, keepdims=True))           # g * rsqrt(||v||^2)
    w = (wv * scale).astype(compute_dtype)                  # (C, C) final conv weight
    b = bias.reshape(C, 1).astype(jnp.float32)

    x_item = jnp.dtype(x.dtype).itemsize
    o_item = jnp.dtype(out_dtype).itemsize
    w_item = jnp.dtype(compute_dtype).itemsize
    total_in_bytes = B * C * T * x_item

    # ---- Batch fold into the lane axis: ONLY for tiny, latency-bound inputs -----
    # (fold = an extra HBM read+write pass over x and out at scale)
    folded = (T < 128) and (B > 1) and (total_in_bytes <= (8 << 20))
    if folded:
        xk = jnp.transpose(x, (1, 0, 2)).reshape(1, C, B * T)   # (1, C, B*T)
        Bk, Tk = 1, B * T
    else:
        xk, Bk, Tk = x, B, T
    # TODO(synk): large-B / T<128 unfolded inputs still use narrow (T-lane) tiles; an
    # in-VMEM batch-packing variant would avoid masked stores without the fold's extra
    # HBM pass.

    # ---- Lane padding only on the tiny folded slab (unmasked 128-lane stores) ---
    Tp = Tk
    if folded and (Tk % 128 != 0):
        Tp = 128 * pl.cdiv(Tk, 128)
        xk = jnp.pad(xk, ((0, 0), (0, 0), (0, Tp - Tk)))     # tiny copy by construction

    # ---- Adaptive lane-dense time tile (multiple of 128, ~target bytes/step) ----
    if Tp < 128:
        tT = Tp                                               # full-dim block (legal)
    else:
        lanes = max(128, (target_tile_bytes // (C * x_item)) // 128 * 128)
        tT = int(min(lanes, (Tp // 128) * 128))

    # ---- Generation-aware VMEM budget: shrink the tile rather than over-raising --
    try:
        vmem_cap = pltpu.get_tpu_info().vmem_capacity_bytes   # 64 MiB on v7x, 128 on v5e/v6e
    except Exception:                                         # pragma: no cover
        vmem_cap = 64 << 20                                   # conservative (v7x per-TC)
    budget = min(vmem_cap // 2, 32 << 20)

    def _need(t):
        # double-buffered x/out tiles + (double-buffered, but tiny) W and bias
        return 2 * C * t * (x_item + o_item) + 2 * C * C * w_item + 2 * C * 4

    while _need(tT) > budget and tT > 128:
        tT = max(128, (tT // 2) // 128 * 128)

    nB = Bk
    nT = pl.cdiv(Tp, tT)

    # ---- v7x megacore: ensure >= 2 grid steps when the lane axis allows it -------
    if nB * nT < 2 and Tp >= 256 and Tp % 128 == 0:
        groups = Tp // 128
        tT = 128 * ((groups + 1) // 2)
        nT = pl.cdiv(Tp, tT)                                  # -> 2

    cp_kwargs = {}
    need = _need(tT)
    if need > (12 << 20):                                     # above smallest (v5e) scoped default
        cp_kwargs["vmem_limit_bytes"] = int(min(need + (4 << 20), budget))

    cost = pl.CostEstimate(
        flops=2 * B * C * C * T,
        transcendentals=0,
        bytes_accessed=int(total_in_bytes + B * C * T * o_item + C * C * w_item + C * 4),
    )

    out = pl.pallas_call(
        _wn_conv1x1_kernel,
        out_shape=jax.ShapeDtypeStruct((Bk, C, Tp), out_dtype),
        grid_spec=pltpu.PrefetchScalarGridSpec(
            num_scalar_prefetch=0,
            grid=(nB, nT),
            in_specs=[
                pl.BlockSpec((C, C), lambda bi, ti: (0, 0)),      # W: constant index -> one DMA
                pl.BlockSpec((C, 1), lambda bi, ti: (0, 0)),      # bias: constant index
                pl.BlockSpec((pl.Squeezed(), C, tT), lambda bi, ti: (bi, 0, ti)),
            ],
            out_specs=pl.BlockSpec((pl.Squeezed(), C, tT), lambda bi, ti: (bi, 0, ti)),
        ),
        compiler_params=pltpu.CompilerParams(
            dimension_semantics=("parallel", "parallel"),     # both grid axes independent
            **cp_kwargs,
        ),
        cost_estimate=cost,
    )(w, b, xk)

    if Tp != Tk:
        out = out[:, :, :Tk]
    if folded:
        out = jnp.transpose(out.reshape(C, B, T), (1, 0, 2))
    return out


def _reference(x, weight_v, weight_g, bias):
    """Plain-JAX reference mirroring the PyTorch 'task' branch (sqrt + divide)."""
    C = x.shape[1]
    wv = weight_v.reshape(C, C)
    norm = jnp.sqrt(jnp.sum(wv * wv, axis=1, keepdims=True))
    w = wv * (weight_g.reshape(C, 1) / norm)
    return jnp.einsum("oi,bit->bot", w, x) + bias.reshape(1, C, 1)


def make_subject_params(key, dataset_keys, subject_keys, block_dim):
    """Deterministic per-(dataset, subject) weight_v / weight_g / bias params."""
    params = {}
    for dk in dataset_keys:
        params[dk] = {}
        for sk in subject_keys[dk]:
            key, k1, k2, k3 = jax.random.split(key, 4)
            weight_v = jax.random.normal(k1, (block_dim, block_dim, 1), jnp.float32) * 0.1
            weight_g = jax.random.uniform(k2, (block_dim, 1, 1), jnp.float32,
                                          minval=0.5, maxval=1.5)
            bias = jax.random.normal(k3, (block_dim,), jnp.float32) * 0.01
            params[dk][sk] = dict(weight_v=weight_v, weight_g=weight_g, bias=bias)
    return params


if __name__ == "__main__":
    key = jax.random.PRNGKey(0)

    # Synthetic "subject dict" replacing the glob over DATA_PATH.
    # TODO(synk): real module discovers subject keys from the filesystem; fixed here.
    dataset_keys = ["dsA", "dsB"]
    subject_keys = {"dsA": ["01", "02"], "dsB": ["01"]}

    B, C, T = 2, 32, 16           # batch, block_dim (channels), sequence length
    params = make_subject_params(key, dataset_keys, subject_keys, block_dim=C)

    key, kx = jax.random.split(key)
    x = jax.random.normal(kx, (B, C, T), jnp.float32)

    dk, sk = "dsA", "02"          # dict lookup is plain-Python glue, as in the module
    p = params[dk][sk]
    ref = _reference(x, p["weight_v"], p["weight_g"], p["bias"])

    # Default path (auto compute dtype -> f32 at this small C): tight tolerance.
    out = subject_block_task(x, p["weight_v"], p["weight_g"], p["bias"])
    out = jax.block_until_ready(out)
    assert out.shape == (B, C, T) and out.dtype == x.dtype
    assert jnp.allclose(out, ref, atol=1e-5, rtol=1e-5), \
        f"f32 (auto) path max err {jnp.max(jnp.abs(out - ref))}"

    # Explicit bf16 MXU-operand path -- bf16-level tolerance.
    out16 = subject_block_task(x, p["weight_v"], p["weight_g"], p["bias"],
                               compute_dtype=jnp.bfloat16)
    out16 = jax.block_until_ready(out16)
    assert jnp.allclose(out16, ref, atol=2e-2, rtol=2e-2), \
        f"bf16 path max err {jnp.max(jnp.abs(out16 - ref))}"

    # Tiled, non-folded path with a ragged time axis (boundary block masking, no pad).
    key, kx2 = jax.random.split(key)
    B2, T2 = 2, 160
    x2 = jax.random.normal(kx2, (B2, C, T2), jnp.float32)
    ref2 = _reference(x2, p["weight_v"], p["weight_g"], p["bias"])
    out2 = subject_block_task(x2, p["weight_v"], p["weight_g"], p["bias"])
    out2 = jax.block_until_ready(out2)
    assert out2.shape == (B2, C, T2)
    assert jnp.allclose(out2, ref2, atol=1e-5, rtol=1e-5), \
        f"tiled path max err {jnp.max(jnp.abs(out2 - ref2))}"

    print("KERNEL_OK")
</pallas_src>

<mosaic_0001>
module attributes {stable_mosaic.version = 11 : i64} {
  func.func @_wn_conv1x1_kernel(%arg0: i32, %arg1: i32, %arg2: memref<32x32xf32, #tpu.memory_space<vmem>>, %arg3: memref<32x1xf32, #tpu.memory_space<vmem>>, %arg4: memref<1x32x128xf32, #tpu.memory_space<vmem>>, %arg5: memref<1x32x128xf32, #tpu.memory_space<vmem>>) attributes {dimension_semantics = [#tpu.dimension_semantics<parallel>, #tpu.dimension_semantics<parallel>], iteration_bounds = array<i64: 1, 1>, scalar_prefetch = 0 : i64, scratch_operands = 0 : i64, tpu.core_type = #tpu.core_type<tc>, window_params = [{pipeline_mode = #tpu.pipeline_mode<synchronous>, transform_indices = @transform_0, window_bounds = array<i64: 32, 32>}, {pipeline_mode = #tpu.pipeline_mode<synchronous>, transform_indices = @transform_1, window_bounds = array<i64: 32, 1>}, {transform_indices = @transform_2, window_bounds = array<i64: 1, 32, 128>}, {transform_indices = @transform_3, window_bounds = array<i64: 1, 32, 128>}]} {
    %c0 = arith.constant 0 : index
    %c0_0 = arith.constant 0 : index
    %c0_1 = arith.constant 0 : index
    %0 = vector.load %arg4[%c0, %c0_0, %c0_1] : memref<1x32x128xf32, #tpu.memory_space<vmem>>, vector<1x32x128xf32>
    %1 = vector.shape_cast %0 : vector<1x32x128xf32> to vector<32x128xf32>
    %c0_2 = arith.constant 0 : index
    %c0_3 = arith.constant 0 : index
    %2 = vector.load %arg2[%c0_2, %c0_3] : memref<32x32xf32, #tpu.memory_space<vmem>>, vector<32x32xf32>
    %cst = arith.constant dense<0.000000e+00> : vector<32x128xf32>
    %3 = tpu.matmul %2, %1, %cst {dimension_numbers = #tpu.dot_dimension_numbers<[1], [0], [0], [1], [0, 0, 1, 1], [], []>} : vector<32x32xf32>, vector<32x128xf32>, vector<32x128xf32> -> vector<32x128xf32>
    %c0_4 = arith.constant 0 : index
    %c0_5 = arith.constant 0 : index
    %4 = vector.load %arg3[%c0_4, %c0_5] : memref<32x1xf32, #tpu.memory_space<vmem>>, vector<32x1xf32>
    %5 = vector.broadcast %4 : vector<32x1xf32> to vector<32x128xf32>
    %6 = arith.addf %3, %5 : vector<32x128xf32>
    %c0_6 = arith.constant 0 : index
    %c0_7 = arith.constant 0 : index
    %c0_8 = arith.constant 0 : index
    %7 = vector.load %arg5[%c0_6, %c0_7, %c0_8] : memref<1x32x128xf32, #tpu.memory_space<vmem>>, vector<1x32x128xf32>
    %8 = vector.shape_cast %7 : vector<1x32x128xf32> to vector<32x128xf32>
    %9 = vector.shape_cast %6 : vector<32x128xf32> to vector<1x32x128xf32>
    tpu.vector_store %arg5[%c0_6, %c0_7, %c0_8], %9 {strides = array<i32>} : memref<1x32x128xf32, #tpu.memory_space<vmem>>, vector<1x32x128xf32>,
    return
  }
  func.func @transform_0(%arg0: i32, %arg1: i32) -> (i32, i32) {
    %c0_i32 = arith.constant 0 : i32
    %c0_i32_0 = arith.constant 0 : i32
    %c0_i32_1 = arith.constant 0 : i32
    return %c0_i32, %c0_i32_0 : i32, i32
  }
  func.func @transform_1(%arg0: i32, %arg1: i32) -> (i32, i32) {
    %c0_i32 = arith.constant 0 : i32
    %c0_i32_0 = arith.constant 0 : i32
    %c0_i32_1 = arith.constant 0 : i32
    return %c0_i32, %c0_i32_0 : i32, i32
  }
  func.func @transform_2(%arg0: i32, %arg1: i32) -> (i32, i32, i32) {
    %c0_i32 = arith.constant 0 : i32
    %c0_i32_0 = arith.constant 0 : i32
    return %arg0, %c0_i32, %arg1 : i32, i32, i32
  }
  func.func @transform_3(%arg0: i32, %arg1: i32) -> (i32, i32, i32) {
    %c0_i32 = arith.constant 0 : i32
    %c0_i32_0 = arith.constant 0 : i32
    return %arg0, %c0_i32, %arg1 : i32, i32, i32
  }
}

</mosaic_0001>

<bundles_post_ra>
// kernel: tpu_custom_call.1
= control target key start
LH: loop header
LB: loop body
LE: loop exit
PB: predicated region body
PF: predicated region fallthrough
CT: control target
= control target key end

     0   :  { %8 = vsyncpa [#allocation3], 0  ;;  %s264_s0 = inlined_call_operand.vmem [shape: f32[32,32], index: 0, kind: input, shape index: {}]   ;;  %s265_s1 = inlined_call_operand.vmem [shape: f32[32,1], index: 1, kind: input, shape index: {}]   ;;  %s266_s2 = inlined_call_operand.hbm [shape: f32[1,32,128], index: 2, kind: input, shape index: {}]   ;;  %s267_s3 = inlined_call_operand.hbm [shape: f32[1,32,128], index: 3, kind: output, shape index: {}]  }
   0x1   :  { %9 = vsyncpa [#allocation4], 0  ;;  %s18_s14 = sshll.u32 %s266_s2, 4  ;;  %s203_s15 = smov [#allocation2]   ;;  %s19_s14 = int_to_ptr.hbm [resolvable:$true] %s18_s14 }
   0x2   :  { %s20_s16 = sshll.u32 %s203_s15, 4  ;;  %s204_s17 = smov 128   ;;  %s21_s16 = int_to_ptr.vmem [resolvable:$true] %s20_s16 }
   0x3   :  { %s205_s18 = smov 8  }
   0x4   :  { %26 = dma.hbm_to_vmem [thread:$0]  %s19_s14, 512, %s21_s16, [#allocation3], %s204_s17, %s204_s17, %s205_s18  }
   0x5   :  { %199 = dma.done.wait [#allocation3], 512  }
   0x6   :  { %200 = vsyncadd [#allocation3], 4294966784  ;;  %v206_v0 = vmov 0   ;;  %v34_v1 = vld [vmem:[#allocation2 + $0x18] sm:$0xff]  ;;  %v33_v2 = vld [vmem:[#allocation2 + $0x10] sm:$0xff]  ;;  %vm63_vm0 = vcmask 261120  }
   0x7   :  { %150 = vset.pattern.permute.xlu1 %v206_v0  ;;  %149 = vset.pattern.permute.xlu0 %v206_v0  ;;  %v32_v3 = vld [vmem:[#allocation2 + $0x8] sm:$0xff]  ;;  %v31_v4 = vld [vmem:[#allocation2] sm:$0xff]  ;;  %v37_v7 = vld [vmem:[%s264_s0 + $0x10] sm:$0xff]  ;;  %s207_s6 = smov [#allocation5]   ;;  %s115_s10 = sshll.u32 %s267_s3, 4  ;;  %s116_s10 = int_to_ptr.hbm [resolvable:$true] %s115_s10 }
   0x8   :  { %88 = vmatpush.msra.mxu0 %v34_v1  ;;  %132 = vmatpush.msra.mxu1 %v34_v1  ;;  %v35_v5 = vld [vmem:[%s264_s0] sm:$0xff]  ;;  %v36_v6 = vld [vmem:[%s264_s0 + $0x8] sm:$0xff]  ;;  %v38_v8 = vld [vmem:[%s264_s0 + $0x18] sm:$0xff]  ;;  %s113_s7 = sshll.u32 %s207_s6, 4  ;;  %s114_s7 = int_to_ptr.vmem [resolvable:$true] %s113_s7 }
   0x9   :  { %133 = vmatpush.msra.mxu2 %v34_v1  ;;  %134 = vmatpush.msra.mxu3 %v34_v1  ;;  %v41_v9 = vld [vmem:[%s265_s1 + $0x10] sm:$0xff]  ;;  %v39_v10 = vld [vmem:[%s265_s1] sm:$0xff]  ;;  %v42_v11 = vld [vmem:[%s265_s1 + $0x18] sm:$0xff] }
   0xa   :  { %89 = vmatpush.msra.mxu0 %v33_v2  ;;  %135 = vmatpush.msra.mxu1 %v33_v2  ;;  %v40_v12 = vld [vmem:[%s265_s1 + $0x8] sm:$0xff] }
   0xb   :  { %136 = vmatpush.msra.mxu2 %v33_v2  ;;  %137 = vmatpush.msra.mxu3 %v33_v2 }
   0xc   :  { %90 = vmatpush.msra.mxu0 %v32_v3  ;;  %138 = vmatpush.msra.mxu1 %v32_v3 }
   0xd   :  { %139 = vmatpush.msra.mxu2 %v32_v3  ;;  %140 = vmatpush.msra.mxu3 %v32_v3 }
   0xe   :  { %91 = vmatpush.msra.mxu0 %v31_v4  ;;  %141 = vmatpush.msra.mxu1 %v31_v4 }
   0xf   :  { %142 = vmatpush.msra.mxu2 %v31_v4  ;;  %143 = vmatpush.msra.mxu3 %v31_v4 }
  0x10   :  { %128 = vmatmul.msk.f32.vlgmr.msra.gmra.mxu0 %vm63_vm0, %v35_v5  ;;  %129 = vmatmul.msk.f32.vlgmr.msra.gmra.mxu1 %vm63_vm0, %v36_v6 }
  0x11   :  { %130 = vmatmul.msk.f32.vlgmr.msra.gmra.mxu2 %vm63_vm0, %v37_v7  ;;  %131 = vmatmul.msk.f32.vlgmr.msra.gmra.mxu3 %vm63_vm0, %v38_v8 }
  0x12   :  { %55 = vperm.xlu1 %150, %v41_v9   ;;  %45 = vperm.xlu0 %149, %v39_v10  }
  0x1a   :  { %60 = vperm.xlu1 %150, %v42_v11   ;;  %50 = vperm.xlu0 %149, %v40_v12  }
  0x84   :  { %v46_v13 = vpop.permute.xlu0 %45  ;;  %v56_v14 = vpop.permute.xlu1 %55 }
  0x8c   :  { %v51_v15 = vpop.permute.xlu0 %50  ;;  %v61_v20 = vpop.permute.xlu1 %60 }
  0x8d   :  { %v93_v16 = vpop.f32.mrf.mxu0  ;;  %v96_v17 = vpop.f32.mrf.mxu1 }
  0x8e   :  { %v94_v18 = vadd.f32 %v93_v16, %v46_v13  ;;  %v97_v19 = vadd.f32 %v96_v17, %v51_v15 }
  0x90   :  { %105 = vst [vmem:[#allocation5] sm:$0xff] %v94_v18 }
  0x91   :  { %106 = vst [vmem:[#allocation5 + $0x8] sm:$0xff] %v97_v19 }
  0x94   :  { %v99_v21 = vpop.f32.mrf.mxu2  ;;  %v102_v22 = vpop.f32.mrf.mxu3 }
  0x95   :  { %v100_v23 = vadd.f32 %v99_v21, %v56_v14  ;;  %v103_v24 = vadd.f32 %v102_v22, %v61_v20 }
  0x97   :  { %107 = vst [vmem:[#allocation5 + $0x10] sm:$0xff] %v100_v23 }
  0x98   :  { %108 = vst [vmem:[#allocation5 + $0x18] sm:$0xff] %v103_v24 }
  0x99   :  { %121 = dma.vmem_to_hbm [thread:$0]  %s114_s7, 512, %s116_s10, [#allocation4], %s204_s17, %s204_s17, %s205_s18  }
  0x9a   :  { %201 = dma.done.wait [#allocation4], 512  }
  0x9b   :  { %202 = vsyncadd [#allocation4], 4294966784 }
  0x9c   :  { %126 = vsyncpa [#allocation3], 1 }
  0x9d   :  { %127 = vsyncpa [#allocation4], 1 }

</bundles_post_ra>
